<compile_context>
chip_gen: v6e
topology: v6e:2x2x1
jax: 0.10.0
libtpu: 0.0.40
codegen_flags: <defaults>
</compile_context>

<pallas_src>
from functools import partial
import math

import jax
import jax.numpy as jnp
from jax.experimental import pallas as pl
from jax.experimental.pallas import tpu as pltpu

# Bytes allowed for one (input-block + output-block) pair per grid step.
_VMEM_BLOCK_BUDGET = 4 * 1024 * 1024
# Hard cap for the smallest legal tile before we give up and use jnp.pad
# (double-buffered this stays under the 16 MiB v5e scoped-VMEM default).
_VMEM_BLOCK_MAX = 6 * 1024 * 1024


def _pad_lane_kernel(x_ref, o_ref, *, start, in_len, pad_value):
    """Pad along the last (lane) axis of a (rows, out_len) tile."""
    rows, out_len = o_ref.shape
    tail = out_len - (start + in_len)
    if start > 0:   # static -> no store emitted at all for align='left'
        o_ref[:, pl.ds(0, start)] = jnp.full((rows, start), pad_value, o_ref.dtype)
    if tail > 0:
        o_ref[:, pl.ds(start + in_len, tail)] = jnp.full((rows, tail), pad_value, o_ref.dtype)
    o_ref[:, pl.ds(start, in_len)] = x_ref[...]


def _pad_sublane_kernel(x_ref, o_ref, *, start, in_len, pad_value):
    """Pad along the middle (sublane) axis of a (pre, out_len, post) tile."""
    pre, out_len, post = o_ref.shape
    tail = out_len - (start + in_len)
    if start > 0:
        o_ref[:, pl.ds(0, start), :] = jnp.full((pre, start, post), pad_value, o_ref.dtype)
    if tail > 0:
        o_ref[:, pl.ds(start + in_len, tail), :] = jnp.full((pre, tail, post), pad_value, o_ref.dtype)
    o_ref[:, pl.ds(start, in_len), :] = x_ref[...]


def _xla_pad(x, dim, start, missing, pad_value):
    pads = [(0, 0)] * x.ndim
    pads[dim] = (start, missing - start)
    return jnp.pad(x, pads, mode="constant", constant_values=pad_value)


def pad_dim_pallas(x, target_length, align="left", pad_value=0.0, dim=-1,
                   mode="constant", generator=None, small_fallback_elems=0):
    """Pallas equivalent of torchoutil pad_dim (mode='constant').

    small_fallback_elems: if the padded output has fewer elements than this,
    dispatch to XLA's native pad (per-grid-step overhead dominates tiny pads
    and jnp.pad fuses with neighbors). Default 0 so the Pallas kernel always
    runs (keeps the demo on the kernel path).
    """
    if mode != "constant":
        # TODO(synk): reflect / replicate / circular pad modes not implemented.
        raise NotImplementedError("only mode='constant' is implemented")

    ndim = x.ndim
    dim = dim % ndim
    in_len = x.shape[dim]
    missing = max(int(target_length) - in_len, 0)
    if missing == 0:        # pad_dim never truncates
        return x
    out_len = in_len + missing

    if align == "left":
        start = 0
    elif align == "right":
        start = missing
    elif align == "center":
        start = missing // 2
    elif align == "random":
        # TODO(synk): exact torch.Generator stream not reproduced; offset is a
        # host-side uniform draw in [0, missing] from an int-seeded jax.random.
        seed = generator if isinstance(generator, int) else 0
        start = int(jax.random.randint(jax.random.PRNGKey(seed), (), 0, missing + 1))
    else:
        raise ValueError(f"align={align!r} not supported")

    out_shape = x.shape[:dim] + (out_len,) + x.shape[dim + 1:]

    if in_len == 0:                                   # degenerate: pure fill
        return jnp.full(out_shape, pad_value, x.dtype)
    if math.prod(out_shape) < small_fallback_elems:
        return _xla_pad(x, dim, start, missing, pad_value)

    itemsize = jnp.dtype(x.dtype).itemsize
    sub = {1: 32, 2: 16}.get(itemsize, 8)  # sublane packing multiple per dtype

    if dim == ndim - 1:
        # ---- Fast path: pad along lanes on a (rows, L) view (reshape is free).
        rows = math.prod(x.shape[:-1])
        bytes_per_row = (in_len + out_len) * itemsize
        if bytes_per_row * min(rows, sub) > _VMEM_BLOCK_MAX:
            # TODO(synk): stream the padded axis itself for extremely long rows.
            return _xla_pad(x, dim, start, missing, pad_value)
        x2 = x.reshape(rows, in_len)
        tr = min(rows, max(1, _VMEM_BLOCK_BUDGET // bytes_per_row))
        tr = max(sub, (tr // sub) * sub)          # align to sublane packing
        if tr >= rows or rows <= sub:
            tr = rows                             # full dim is always legal
        out2 = pl.pallas_call(
            partial(_pad_lane_kernel, start=start, in_len=in_len,
                    pad_value=pad_value),
            out_shape=jax.ShapeDtypeStruct((rows, out_len), x.dtype),
            grid=(pl.cdiv(rows, tr),),
            in_specs=[pl.BlockSpec((tr, in_len), lambda i: (i, 0))],
            out_specs=pl.BlockSpec((tr, out_len), lambda i: (i, 0)),
            compiler_params=pltpu.CompilerParams(
                dimension_semantics=("parallel",)),
        )(x2)
        return out2.reshape(out_shape)

    # ---- General path: pad along the sublane axis of a (pre, L, post) view.
    pre = math.prod(x.shape[:dim])
    post = math.prod(x.shape[dim + 1:])
    x3 = x.reshape(pre, in_len, post)
    slab = (in_len + out_len) * post * itemsize       # one pre-slice in+out
    if slab <= _VMEM_BLOCK_BUDGET:
        tpost = post                                  # full lane extent
        tpre = max(1, min(pre, _VMEM_BLOCK_BUDGET // max(1, slab)))
    else:
        lane_chunk = (_VMEM_BLOCK_BUDGET // ((in_len + out_len) * itemsize)) // 128 * 128
        if lane_chunk < 128:
            # TODO(synk): stream the padded axis itself instead of XLA fallback.
            return _xla_pad(x, dim, start, missing, pad_value)
        tpre = 1
        tpost = min(lane_chunk, pl.cdiv(post, 128) * 128)

    out3 = pl.pallas_call(
        partial(_pad_sublane_kernel, start=start, in_len=in_len,
                pad_value=pad_value),
        out_shape=jax.ShapeDtypeStruct((pre, out_len, post), x.dtype),
        grid=(pl.cdiv(pre, tpre), pl.cdiv(post, tpost)),
        in_specs=[pl.BlockSpec((tpre, in_len, tpost), lambda i, j: (i, 0, j))],
        out_specs=pl.BlockSpec((tpre, out_len, tpost), lambda i, j: (i, 0, j)),
        compiler_params=pltpu.CompilerParams(
            dimension_semantics=("parallel", "parallel")),
    )(x3)
    return out3.reshape(out_shape)


class PadDimPallas:
    """Mirror of torchoutil.nn.modules.pad.PadDim (forward only)."""

    def __init__(self, target_length, align="left", pad_value=0.0, dim=-1,
                 mode="constant", generator=None):
        self.target_length = target_length
        self.align = align
        self.pad_value = pad_value
        self.dim = dim
        self.mode = mode
        self.generator = generator

    def __call__(self, x):
        return pad_dim_pallas(x, self.target_length, self.align,
                              self.pad_value, self.dim, self.mode,
                              self.generator)


if __name__ == "__main__":
    key = jax.random.PRNGKey(0)
    x = jax.random.normal(key, (2, 4, 16, 16), dtype=jnp.float32)

    # 1) align='left' on the last dim (lane-pad kernel, aligned copy store).
    y1 = jax.block_until_ready(PadDimPallas(24, "left", 0.0, -1)(x))
    r1 = jnp.pad(x, ((0, 0), (0, 0), (0, 0), (0, 8)), constant_values=0.0)
    assert y1.shape == (2, 4, 16, 24) and jnp.allclose(y1, r1)

    # 2) align='center' with a nonzero pad value on the last dim.
    y2 = jax.block_until_ready(PadDimPallas(24, "center", -1.0, -1)(x))
    r2 = jnp.pad(x, ((0, 0), (0, 0), (0, 0), (4, 4)), constant_values=-1.0)
    assert y2.shape == (2, 4, 16, 24) and jnp.allclose(y2, r2)

    # 3) align='right' on dim=2 (sublane-pad kernel, no wrapper transposes).
    y3 = jax.block_until_ready(PadDimPallas(24, "right", 2.5, 2)(x))
    r3 = jnp.pad(x, ((0, 0), (0, 0), (8, 0), (0, 0)), constant_values=2.5)
    assert y3.shape == (2, 4, 24, 16) and jnp.allclose(y3, r3)

    # 4) target shorter than the dim -> no-op (pad_dim never truncates).
    y4 = jax.block_until_ready(PadDimPallas(8, "left", 0.0, -1)(x))
    assert y4.shape == x.shape and jnp.allclose(y4, x)

    # 5) bf16 dtype (different sublane packing) on dim=1.
    xb = x.astype(jnp.bfloat16)
    y5 = jax.block_until_ready(PadDimPallas(6, "center", 0.0, 1)(xb))
    r5 = jnp.pad(xb, ((0, 0), (1, 1), (0, 0), (0, 0)), constant_values=0.0)
    assert y5.shape == (2, 6, 16, 16) and jnp.array_equal(y5, r5)

    print("KERNEL_OK")
</pallas_src>

<mosaic_0001>
module attributes {stable_mosaic.version = 11 : i64} {
  func.func @_pad_lane_kernel(%arg0: i32, %arg1: memref<128x16xf32, #tpu.memory_space<vmem>>, %arg2: memref<128x24xf32, #tpu.memory_space<vmem>>) attributes {dimension_semantics = [#tpu.dimension_semantics<parallel>], iteration_bounds = array<i64: 1>, scalar_prefetch = 0 : i64, scratch_operands = 0 : i64, tpu.core_type = #tpu.core_type<tc>, window_params = [{transform_indices = @transform_0, window_bounds = array<i64: 128, 16>}, {transform_indices = @transform_1, window_bounds = array<i64: 128, 24>}]} {
    %cst = arith.constant 0.000000e+00 : f32
    %0 = vector.broadcast %cst : f32 to vector<128x8xf32>
    %c0 = arith.constant 0 : index
    %c16 = arith.constant 16 : index
    %1 = vector.load %arg2[%c0, %c16] : memref<128x24xf32, #tpu.memory_space<vmem>>, vector<128x8xf32>
    tpu.vector_store %arg2[%c0, %c16], %0 {strides = array<i32>} : memref<128x24xf32, #tpu.memory_space<vmem>>, vector<128x8xf32>,
    %c0_0 = arith.constant 0 : index
    %c0_1 = arith.constant 0 : index
    %2 = vector.load %arg1[%c0_0, %c0_1] : memref<128x16xf32, #tpu.memory_space<vmem>>, vector<128x16xf32>
    %c0_2 = arith.constant 0 : index
    %c0_3 = arith.constant 0 : index
    %3 = vector.load %arg2[%c0_2, %c0_3] : memref<128x24xf32, #tpu.memory_space<vmem>>, vector<128x16xf32>
    tpu.vector_store %arg2[%c0_2, %c0_3], %2 {strides = array<i32>} : memref<128x24xf32, #tpu.memory_space<vmem>>, vector<128x16xf32>,
    return
  }
  func.func @transform_0(%arg0: i32) -> (i32, i32) {
    %c0_i32 = arith.constant 0 : i32
    %c0_i32_0 = arith.constant 0 : i32
    return %arg0, %c0_i32 : i32, i32
  }
  func.func @transform_1(%arg0: i32) -> (i32, i32) {
    %c0_i32 = arith.constant 0 : i32
    %c0_i32_0 = arith.constant 0 : i32
    return %arg0, %c0_i32 : i32, i32
  }
}

</mosaic_0001>

<bundles_post_ra>
// kernel: tpu_custom_call.1
= control target key start
LH: loop header
LB: loop body
LE: loop exit
PB: predicated region body
PF: predicated region fallthrough
CT: control target
= control target key end

     0   :  { %vm8_vm0 = vcmask 195712   ;;  %vm41_vm1 = vcmask 130048   ;;  %v63_v0 = vmov 0.0   ;;  %s250_s1 = inlined_call_operand.vmem [shape: f32[128,24], index: 1, kind: output, shape index: {}]   ;;  %s251_s0 = inlined_call_operand.vmem [shape: f32[128,16], index: 0, kind: input, shape index: {}]  }
   0x1   :  { %9 = vst.msk [vmem:[%s250_s1] sm:$0xff] %vm8_vm0, %v63_v0  ;;  %10 = vst.msk [vmem:[%s250_s1 + $0x8] sm:$0xff] %vm8_vm0, %v63_v0  ;;  %v25_v1 = vld [vmem:[%s251_s0] sm:$0xff]  ;;  %v26_v2 = vld [vmem:[%s251_s0 + $0x8] sm:$0xff] }
   0x2   :  { %11 = vst.msk [vmem:[%s250_s1 + $0x10] sm:$0xff] %vm8_vm0, %v63_v0  ;;  %12 = vst.msk [vmem:[%s250_s1 + $0x18] sm:$0xff] %vm8_vm0, %v63_v0  ;;  %v27_v3 = vld [vmem:[%s251_s0 + $0x10] sm:$0xff]  ;;  %v28_v4 = vld [vmem:[%s251_s0 + $0x18] sm:$0xff] }
   0x3   :  { %13 = vst.msk [vmem:[%s250_s1 + $0x20] sm:$0xff] %vm8_vm0, %v63_v0  ;;  %14 = vst.msk [vmem:[%s250_s1 + $0x28] sm:$0xff] %vm8_vm0, %v63_v0  ;;  %v29_v5 = vld [vmem:[%s251_s0 + $0x20] sm:$0xff]  ;;  %v30_v6 = vld [vmem:[%s251_s0 + $0x28] sm:$0xff] }
   0x4   :  { %15 = vst.msk [vmem:[%s250_s1 + $0x30] sm:$0xff] %vm8_vm0, %v63_v0  ;;  %16 = vst.msk [vmem:[%s250_s1 + $0x38] sm:$0xff] %vm8_vm0, %v63_v0  ;;  %v31_v7 = vld [vmem:[%s251_s0 + $0x30] sm:$0xff]  ;;  %v32_v8 = vld [vmem:[%s251_s0 + $0x38] sm:$0xff] }
   0x5   :  { %17 = vst.msk [vmem:[%s250_s1 + $0x40] sm:$0xff] %vm8_vm0, %v63_v0  ;;  %18 = vst.msk [vmem:[%s250_s1 + $0x48] sm:$0xff] %vm8_vm0, %v63_v0  ;;  %v33_v9 = vld [vmem:[%s251_s0 + $0x40] sm:$0xff]  ;;  %v34_v10 = vld [vmem:[%s251_s0 + $0x48] sm:$0xff] }
   0x6   :  { %19 = vst.msk [vmem:[%s250_s1 + $0x50] sm:$0xff] %vm8_vm0, %v63_v0  ;;  %20 = vst.msk [vmem:[%s250_s1 + $0x58] sm:$0xff] %vm8_vm0, %v63_v0  ;;  %v35_v11 = vld [vmem:[%s251_s0 + $0x50] sm:$0xff]  ;;  %v36_v12 = vld [vmem:[%s251_s0 + $0x58] sm:$0xff] }
   0x7   :  { %21 = vst.msk [vmem:[%s250_s1 + $0x60] sm:$0xff] %vm8_vm0, %v63_v0  ;;  %22 = vst.msk [vmem:[%s250_s1 + $0x68] sm:$0xff] %vm8_vm0, %v63_v0  ;;  %v37_v13 = vld [vmem:[%s251_s0 + $0x60] sm:$0xff]  ;;  %v38_v14 = vld [vmem:[%s251_s0 + $0x68] sm:$0xff] }
   0x8   :  { %23 = vst.msk [vmem:[%s250_s1 + $0x70] sm:$0xff] %vm8_vm0, %v63_v0  ;;  %24 = vst.msk [vmem:[%s250_s1 + $0x78] sm:$0xff] %vm8_vm0, %v63_v0  ;;  %v39_v15 = vld [vmem:[%s251_s0 + $0x70] sm:$0xff]  ;;  %v40_v16 = vld [vmem:[%s251_s0 + $0x78] sm:$0xff] }
   0x9   :  { %42 = vst.msk [vmem:[%s250_s1] sm:$0xff] %vm41_vm1, %v25_v1  ;;  %43 = vst.msk [vmem:[%s250_s1 + $0x8] sm:$0xff] %vm41_vm1, %v26_v2 }
   0xa   :  { %44 = vst.msk [vmem:[%s250_s1 + $0x10] sm:$0xff] %vm41_vm1, %v27_v3  ;;  %45 = vst.msk [vmem:[%s250_s1 + $0x18] sm:$0xff] %vm41_vm1, %v28_v4 }
   0xb   :  { %46 = vst.msk [vmem:[%s250_s1 + $0x20] sm:$0xff] %vm41_vm1, %v29_v5  ;;  %47 = vst.msk [vmem:[%s250_s1 + $0x28] sm:$0xff] %vm41_vm1, %v30_v6 }
   0xc   :  { %48 = vst.msk [vmem:[%s250_s1 + $0x30] sm:$0xff] %vm41_vm1, %v31_v7  ;;  %49 = vst.msk [vmem:[%s250_s1 + $0x38] sm:$0xff] %vm41_vm1, %v32_v8 }
   0xd   :  { %50 = vst.msk [vmem:[%s250_s1 + $0x40] sm:$0xff] %vm41_vm1, %v33_v9  ;;  %51 = vst.msk [vmem:[%s250_s1 + $0x48] sm:$0xff] %vm41_vm1, %v34_v10 }
   0xe   :  { %52 = vst.msk [vmem:[%s250_s1 + $0x50] sm:$0xff] %vm41_vm1, %v35_v11  ;;  %53 = vst.msk [vmem:[%s250_s1 + $0x58] sm:$0xff] %vm41_vm1, %v36_v12 }
   0xf   :  { %54 = vst.msk [vmem:[%s250_s1 + $0x60] sm:$0xff] %vm41_vm1, %v37_v13  ;;  %55 = vst.msk [vmem:[%s250_s1 + $0x68] sm:$0xff] %vm41_vm1, %v38_v14 }
  0x10   :  { %56 = vst.msk [vmem:[%s250_s1 + $0x70] sm:$0xff] %vm41_vm1, %v39_v15  ;;  %57 = vst.msk [vmem:[%s250_s1 + $0x78] sm:$0xff] %vm41_vm1, %v40_v16 }

</bundles_post_ra>
